<compile_context>
chip_gen: v6e
topology: v6e:2x2x1
jax: 0.10.0
libtpu: 0.0.40
codegen_flags: <defaults>
</compile_context>

<pallas_src>
import functools
import math

import jax
import jax.numpy as jnp
from jax.experimental import pallas as pl
from jax.experimental.pallas import tpu as pltpu

# ----------------------------- config ---------------------------------------
VOCAB = 128          # small synthetic vocab (real model: ~28996)
MAX_POS = 64
TYPE_VOCAB = 2
HIDDEN = 768         # must stay 768: dimension_reducer = Linear(768, 256)
NUM_HEADS = 12
HEAD_DIM = HIDDEN // NUM_HEADS   # 64
INTERMEDIATE = 3072
NUM_LAYERS = 2       # real model has 12; reduced for the synthetic script
REDUCED = 256
LN_EPS = 1e-12

_INV_SQRT2 = 0.7071067811865476
_ROW_TARGET = 256    # target rows (n_batch * seq_len) per fused-layer grid step


def _vmem_limit_bytes():
    """Generation-aware scoped-VMEM limit (leave headroom for Mosaic scratch)."""
    cap = 128 * 1024 * 1024
    try:
        cap = int(getattr(pltpu.get_tpu_info(), "vmem_capacity_bytes", cap))
    except Exception:
        pass
    # v5e/v6e (128 MiB) -> 104 MiB; v7x (64 MiB) -> 40 MiB.
    return max(32 * 1024 * 1024, cap - 24 * 1024 * 1024)


_VMEM_LIMIT = _vmem_limit_bytes()


def _batch_per_step(batch, seq_len):
    """How many batch elements to fuse into one grid step (fills matmul M)."""
    n_b = max(1, min(batch, _ROW_TARGET // max(seq_len, 1)))
    while batch % n_b:
        n_b -= 1
    return n_b


def _const_spec(shape):
    """BlockSpec for operands whose block never changes across the grid.

    pipeline_mode=pl.Buffered(1): single VMEM buffer (no double-buffering) for
    constant-index operands -> halves resident-weight VMEM.
    """
    index_map = lambda *_: (0,) * len(shape)
    try:
        return pl.BlockSpec(shape, index_map, pipeline_mode=pl.Buffered(1))
    except TypeError:           # older BlockSpec signature without pipeline_mode
        return pl.BlockSpec(shape, index_map)


def _ln(h, g, b):
    """LayerNorm over the last dim in f32, eps=1e-12 (matches PyTorch)."""
    mean = jnp.mean(h, axis=-1, keepdims=True)
    var = jnp.mean((h - mean) * (h - mean), axis=-1, keepdims=True)
    return (h - mean) * jax.lax.rsqrt(var + LN_EPS) * g + b


# ----------------------------- kernels --------------------------------------
def _emb_ln_kernel(we_ref, pt_ref, g_ref, b_ref, o_ref, *, n_batch):
    """LayerNorm(word_emb + pos_emb + type_emb) without materializing the sum
    in HBM.  we_ref: (n_b*S, 768) gathered word embeddings; pt_ref: (S, 768)
    pos+type embeddings (shared across batch elements)."""
    pt = pt_ref[...]
    if n_batch > 1:
        pt = jnp.concatenate([pt] * n_batch, axis=0)
    o_ref[...] = _ln(we_ref[...] + pt, g_ref[...], b_ref[...])


def _layer_kernel(x_ref, bias_ref, wqkv_ref, bqkv_ref, wo_ref, bo_ref,
                  ln1g_ref, ln1b_ref, w1_ref, b1_ref, w2_ref, b2_ref,
                  ln2g_ref, ln2b_ref, o_ref, ctx_ref, *,
                  seq_len, n_batch, scale):
    """One full BERT encoder layer (attention + FFN) for n_batch elements.

    x_ref:    (n_b*S, 768) f32 hidden states
    bias_ref: (n_b, S) additive key bias (1-mask)*-1e4
    ctx_ref:  (n_b*S, 768) f32 VMEM scratch holding the concatenated per-head
              attention contexts (so the Wo projection is ONE K=768 matmul)
    o_ref:    (n_b*S, 768) f32 output (lane dense)
    """
    x = x_ref[...]                                              # (R, 768) f32
    # Fused QKV projection: one (R,768)@(768,2304) MXU pass.
    qkv = jnp.dot(x.astype(jnp.bfloat16), wqkv_ref[...],
                  preferred_element_type=jnp.float32) + bqkv_ref[...]
    q = qkv[:, :HIDDEN] * scale       # fold 1/sqrt(d) into q: O(R*H), not O(S^2)
    k = qkv[:, HIDDEN:2 * HIDDEN]
    v = qkv[:, 2 * HIDDEN:]

    # Per-batch-element, per-head softmax(QK^T)V.  Each head's context is
    # written to its 64-lane slot of the VMEM scratch; the output projection
    # below is then a single K=768 matmul instead of 12 K=64 accumulations.
    # TODO(synk): for long sequences replace the materialized-score head loop
    # with a flash-style online-softmax tiled over KV.
    for b in range(n_batch):
        r0 = b * seq_len
        bias = bias_ref[b:b + 1, :]                             # (1, S)
        for h in range(NUM_HEADS):
            lo = h * HEAD_DIM
            qh = q[r0:r0 + seq_len, lo:lo + HEAD_DIM].astype(jnp.bfloat16)
            kh = k[r0:r0 + seq_len, lo:lo + HEAD_DIM].astype(jnp.bfloat16)
            vh = v[r0:r0 + seq_len, lo:lo + HEAD_DIM].astype(jnp.bfloat16)
            s = jax.lax.dot_general(qh, kh, (((1,), (1,)), ((), ())),
                                    preferred_element_type=jnp.float32)  # (S,S)
            s = s + bias                                        # per-key bias
            s = s - jnp.max(s, axis=-1, keepdims=True)
            e = jnp.exp(s)
            # approx reciprocal runs on the EUP slot; ~1e-3-level rel. error vs
            # exact division, within this frozen encoder's bf16 tolerance.
            p = e * pl.reciprocal(jnp.sum(e, axis=-1, keepdims=True),
                                  approx=True)
            ctx_ref[r0:r0 + seq_len, lo:lo + HEAD_DIM] = jnp.dot(
                p.astype(jnp.bfloat16), vh, preferred_element_type=jnp.float32)

    # Single (R,768)@(768,768) output projection (K=768 fills MXU depth).
    attn = jnp.dot(ctx_ref[...].astype(jnp.bfloat16), wo_ref[...],
                   preferred_element_type=jnp.float32) + bo_ref[...]
    h1 = _ln(attn + x, ln1g_ref[...], ln1b_ref[...])

    # FFN fused in the same kernel: the attention output never leaves VMEM.
    t = jnp.dot(h1.astype(jnp.bfloat16), w1_ref[...],
                preferred_element_type=jnp.float32) + b1_ref[...]
    # erf-GELU in bf16 (feeds a bf16 matmul anyway; halves VPU work on v6e/v7x,
    # Mosaic extends to f32 on chips without bf16 VPU math).
    t16 = t.astype(jnp.bfloat16)
    gelu = 0.5 * t16 * (1.0 + jax.lax.erf(t16 * _INV_SQRT2))
    y = jnp.dot(gelu.astype(jnp.bfloat16), w2_ref[...],
                preferred_element_type=jnp.float32) + b2_ref[...]
    o_ref[...] = _ln(y + h1, ln2g_ref[...], ln2b_ref[...])


# ----------------------------- wrappers -------------------------------------
def embed_layernorm(we, pos_type, gamma, beta, *, seq_len, n_batch):
    """we: (B*S, 768) gathered word embeddings -> LayerNorm(we+pos+type)."""
    m, h = we.shape
    rows = n_batch * seq_len
    kern = functools.partial(_emb_ln_kernel, n_batch=n_batch)
    return pl.pallas_call(
        kern,
        grid=(m // rows,),
        out_shape=jax.ShapeDtypeStruct((m, h), jnp.float32),
        in_specs=[
            pl.BlockSpec((rows, h), lambda i: (i, 0)),   # word embeddings
            _const_spec((seq_len, h)),                   # pos + type embeddings
            _const_spec((1, h)),                         # ln gamma
            _const_spec((1, h)),                         # ln beta
        ],
        out_specs=pl.BlockSpec((rows, h), lambda i: (i, 0)),
        compiler_params=pltpu.CompilerParams(
            dimension_semantics=("parallel",),
            vmem_limit_bytes=_VMEM_LIMIT),
    )(we, pos_type, gamma, beta)


def encoder_layer(x, mask_bias, lp, *, seq_len, n_batch):
    """x: (B*S, 768) f32 -> full BERT layer (attention + FFN), one pallas_call."""
    m, h = x.shape
    batch = m // seq_len
    rows = n_batch * seq_len
    kern = functools.partial(_layer_kernel, seq_len=seq_len, n_batch=n_batch,
                             scale=1.0 / math.sqrt(HEAD_DIM))
    return pl.pallas_call(
        kern,
        grid=(batch // n_batch,),
        out_shape=jax.ShapeDtypeStruct((m, h), jnp.float32),
        in_specs=[
            pl.BlockSpec((rows, HIDDEN), lambda i: (i, 0)),        # x
            pl.BlockSpec((n_batch, seq_len), lambda i: (i, 0)),    # mask bias
            _const_spec((HIDDEN, 3 * HIDDEN)),                     # wqkv
            _const_spec((1, 3 * HIDDEN)),                          # bqkv
            _const_spec((HIDDEN, HIDDEN)),                         # wo
            _const_spec((1, HIDDEN)),                              # bo
            _const_spec((1, HIDDEN)),                              # ln1 gamma
            _const_spec((1, HIDDEN)),                              # ln1 beta
            _const_spec((HIDDEN, INTERMEDIATE)),                   # w1
            _const_spec((1, INTERMEDIATE)),                        # b1
            _const_spec((INTERMEDIATE, HIDDEN)),                   # w2
            _const_spec((1, HIDDEN)),                              # b2
            _const_spec((1, HIDDEN)),                              # ln2 gamma
            _const_spec((1, HIDDEN)),                              # ln2 beta
        ],
        out_specs=pl.BlockSpec((rows, HIDDEN), lambda i: (i, 0)),  # lane dense
        scratch_shapes=[pltpu.VMEM((rows, HIDDEN), jnp.float32)],  # ctx scratch
        compiler_params=pltpu.CompilerParams(
            dimension_semantics=("parallel",),
            vmem_limit_bytes=_VMEM_LIMIT),
    )(x, mask_bias, lp["wqkv"], lp["bqkv"], lp["wo"], lp["bo"],
      lp["ln1_g"], lp["ln1_b"], lp["w1"], lp["b1"], lp["w2"], lp["b2"],
      lp["ln2_g"], lp["ln2_b"])


# ----------------------------- parameters -----------------------------------
def init_params(key):
    keys = iter(jax.random.split(key, 4 + 4 * NUM_LAYERS))

    def init(shape, dtype=jnp.bfloat16):
        # frozen weights stored in bf16 (MXU inputs); accumulation stays f32.
        # TODO(synk): on v7x, fp8 (e4m3) weight storage would halve weight
        # VMEM/HBM traffic; kept bf16 for portability/accuracy here.
        return (0.02 * jax.random.normal(next(keys), shape, jnp.float32)
                ).astype(dtype)

    ones = lambda n: jnp.ones((1, n), jnp.float32)
    zeros = lambda n: jnp.zeros((1, n), jnp.float32)

    params = {
        "word_emb": init((VOCAB, HIDDEN), jnp.float32),
        "pos_emb": init((MAX_POS, HIDDEN), jnp.float32),
        "type_emb": init((TYPE_VOCAB, HIDDEN), jnp.float32),
        "emb_ln_g": ones(HIDDEN), "emb_ln_b": zeros(HIDDEN),
        "layers": [],
        # dimension_reducer = nn.Linear(768, 256); weight stored as (in, out).
        "red_w": init((HIDDEN, REDUCED), jnp.float32), "red_b": zeros(REDUCED),
    }
    for _ in range(NUM_LAYERS):
        params["layers"].append({
            # fused [Wq | Wk | Wv] and [bq | bk | bv]
            "wqkv": init((HIDDEN, 3 * HIDDEN)), "bqkv": zeros(3 * HIDDEN),
            "wo": init((HIDDEN, HIDDEN)), "bo": zeros(HIDDEN),
            "ln1_g": ones(HIDDEN), "ln1_b": zeros(HIDDEN),
            "w1": init((HIDDEN, INTERMEDIATE)), "b1": zeros(INTERMEDIATE),
            "w2": init((INTERMEDIATE, HIDDEN)), "b2": zeros(HIDDEN),
            "ln2_g": ones(HIDDEN), "ln2_b": zeros(HIDDEN),
        })
    return params


# ----------------------------- forward --------------------------------------
def frozen_language_model(params, input_ids, attention_mask):
    b, s = input_ids.shape
    m = b * s
    n_b = _batch_per_step(b, s)

    # Embedding gather is a data-dependent row lookup with no clean rectangular
    # Pallas tile pattern at this size; kept in plain JAX glue.
    # TODO(synk): for a large vocab this would become a manual-DMA gather.
    we = params["word_emb"][input_ids].reshape(m, HIDDEN)          # (B*S, H)
    pos_type = params["pos_emb"][:s] + params["type_emb"][0][None, :]  # (S, H)
    # LayerNorm(word + pos + type) fused in one kernel (no HBM `emb` tensor).
    x = embed_layernorm(we, pos_type, params["emb_ln_g"], params["emb_ln_b"],
                        seq_len=s, n_batch=n_b)

    # extended attention mask: (1 - mask) * -10000, added to attention scores
    mask_bias = (1.0 - attention_mask.astype(jnp.float32)) * -10000.0  # (B, S)

    # ONE fused pallas_call per encoder layer; activations stay (B*S, 768).
    # TODO(synk): a cross-pallas_call DMA future could prefetch layer L+1's
    # weights during layer L to hide the weight DMA at small batch.
    for lp in params["layers"]:
        x = encoder_layer(x, mask_bias, lp, seq_len=s, n_batch=n_b)

    # sentence_representation = last_hidden_state[:, 0, :]  (CLS token)
    cls = x.reshape(b, s, HIDDEN)[:, 0, :]                     # (B, 768)
    # reduced_representation = dimension_reducer(cls) -> (B, 256).
    # Per perf review: at small B a dedicated pallas_call here is pure
    # launch/DMA overhead, so the tiny matmul is left to XLA.
    return jnp.dot(cls, params["red_w"]) + params["red_b"]


# ----------------------------- main -----------------------------------------
if __name__ == "__main__":
    key = jax.random.PRNGKey(0)
    pkey, dkey = jax.random.split(key)
    params = init_params(pkey)

    B, S = 2, 8
    input_ids = jax.random.randint(dkey, (B, S), 0, VOCAB, dtype=jnp.int32)
    attention_mask = jnp.array(
        [[1, 1, 1, 1, 1, 1, 1, 1],
         [1, 1, 1, 1, 1, 0, 0, 0]], dtype=jnp.int32)

    out = frozen_language_model(params, input_ids, attention_mask)
    out = jax.block_until_ready(out)

    assert out.shape == (B, REDUCED), out.shape
    assert out.dtype == jnp.float32, out.dtype
    assert bool(jnp.all(jnp.isfinite(out)))
    print("KERNEL_OK")
</pallas_src>

<mosaic_0001>
module attributes {stable_mosaic.version = 11 : i64} {
  func.func @_emb_ln_kernel(%arg0: i32, %arg1: memref<16x768xf32, #tpu.memory_space<vmem>>, %arg2: memref<8x768xf32, #tpu.memory_space<vmem>>, %arg3: memref<1x768xf32, #tpu.memory_space<vmem>>, %arg4: memref<1x768xf32, #tpu.memory_space<vmem>>, %arg5: memref<16x768xf32, #tpu.memory_space<vmem>>) attributes {dimension_semantics = [#tpu.dimension_semantics<parallel>], iteration_bounds = array<i64: 1>, scalar_prefetch = 0 : i64, scratch_operands = 0 : i64, tpu.core_type = #tpu.core_type<tc>, window_params = [{transform_indices = @transform_0, window_bounds = array<i64: 16, 768>}, {pipeline_mode = #tpu.pipeline_mode<synchronous>, transform_indices = @transform_1, window_bounds = array<i64: 8, 768>}, {pipeline_mode = #tpu.pipeline_mode<synchronous>, transform_indices = @transform_2, window_bounds = array<i64: 1, 768>}, {pipeline_mode = #tpu.pipeline_mode<synchronous>, transform_indices = @transform_3, window_bounds = array<i64: 1, 768>}, {transform_indices = @transform_4, window_bounds = array<i64: 16, 768>}]} {
    %c0 = arith.constant 0 : index
    %c0_0 = arith.constant 0 : index
    %0 = vector.load %arg2[%c0, %c0_0] : memref<8x768xf32, #tpu.memory_space<vmem>>, vector<8x768xf32>
    %1 = tpu.concatenate %0, %0 in 0 : vector<8x768xf32>, vector<8x768xf32> -> vector<16x768xf32>
    %c0_1 = arith.constant 0 : index
    %c0_2 = arith.constant 0 : index
    %2 = vector.load %arg1[%c0_1, %c0_2] : memref<16x768xf32, #tpu.memory_space<vmem>>, vector<16x768xf32>
    %3 = arith.addf %2, %1 : vector<16x768xf32>
    %c0_3 = arith.constant 0 : index
    %c0_4 = arith.constant 0 : index
    %4 = vector.load %arg3[%c0_3, %c0_4] : memref<1x768xf32, #tpu.memory_space<vmem>>, vector<1x768xf32>
    %c0_5 = arith.constant 0 : index
    %c0_6 = arith.constant 0 : index
    %5 = vector.load %arg4[%c0_5, %c0_6] : memref<1x768xf32, #tpu.memory_space<vmem>>, vector<1x768xf32>
    %cst = arith.constant dense<0.000000e+00> : vector<16xf32>
    %6 = vector.multi_reduction <add>, %3, %cst [1] : vector<16x768xf32> to vector<16xf32>
    %7 = vector.shape_cast %6 : vector<16xf32> to vector<16x1xf32>
    %cst_7 = arith.constant 7.680000e+02 : f32
    %8 = vector.broadcast %cst_7 : f32 to vector<16x1xf32>
    %9 = arith.divf %7, %8 : vector<16x1xf32>
    %10 = vector.broadcast %9 : vector<16x1xf32> to vector<16x768xf32>
    %11 = arith.subf %3, %10 : vector<16x768xf32>
    %12 = vector.broadcast %9 : vector<16x1xf32> to vector<16x768xf32>
    %13 = arith.subf %3, %12 : vector<16x768xf32>
    %14 = arith.mulf %11, %13 : vector<16x768xf32>
    %cst_8 = arith.constant dense<0.000000e+00> : vector<16xf32>
    %15 = vector.multi_reduction <add>, %14, %cst_8 [1] : vector<16x768xf32> to vector<16xf32>
    %16 = vector.shape_cast %15 : vector<16xf32> to vector<16x1xf32>
    %cst_9 = arith.constant 7.680000e+02 : f32
    %17 = vector.broadcast %cst_9 : f32 to vector<16x1xf32>
    %18 = arith.divf %16, %17 : vector<16x1xf32>
    %19 = vector.broadcast %9 : vector<16x1xf32> to vector<16x768xf32>
    %20 = arith.subf %3, %19 : vector<16x768xf32>
    %cst_10 = arith.constant 9.99999996E-13 : f32
    %21 = vector.broadcast %cst_10 : f32 to vector<16x1xf32>
    %22 = arith.addf %18, %21 : vector<16x1xf32>
    %23 = math.rsqrt %22 : vector<16x1xf32>
    %24 = vector.broadcast %23 : vector<16x1xf32> to vector<16x768xf32>
    %25 = arith.mulf %20, %24 : vector<16x768xf32>
    %26 = vector.broadcast %4 : vector<1x768xf32> to vector<16x768xf32>
    %27 = arith.mulf %25, %26 : vector<16x768xf32>
    %28 = vector.broadcast %5 : vector<1x768xf32> to vector<16x768xf32>
    %29 = arith.addf %27, %28 : vector<16x768xf32>
    %c0_11 = arith.constant 0 : index
    %c0_12 = arith.constant 0 : index
    %30 = vector.load %arg5[%c0_11, %c0_12] : memref<16x768xf32, #tpu.memory_space<vmem>>, vector<16x768xf32>
    tpu.vector_store %arg5[%c0_11, %c0_12], %29 {strides = array<i32>} : memref<16x768xf32, #tpu.memory_space<vmem>>, vector<16x768xf32>,
    return
  }
  func.func @transform_0(%arg0: i32) -> (i32, i32) {
    %c0_i32 = arith.constant 0 : i32
    %c0_i32_0 = arith.constant 0 : i32
    return %arg0, %c0_i32 : i32, i32
  }
  func.func @transform_1(%arg0: i32) -> (i32, i32) {
    %c0_i32 = arith.constant 0 : i32
    %c0_i32_0 = arith.constant 0 : i32
    %c0_i32_1 = arith.constant 0 : i32
    return %c0_i32, %c0_i32_0 : i32, i32
  }
  func.func @transform_2(%arg0: i32) -> (i32, i32) {
    %c0_i32 = arith.constant 0 : i32
    %c0_i32_0 = arith.constant 0 : i32
    %c0_i32_1 = arith.constant 0 : i32
    return %c0_i32, %c0_i32_0 : i32, i32
  }
  func.func @transform_3(%arg0: i32) -> (i32, i32) {
    %c0_i32 = arith.constant 0 : i32
    %c0_i32_0 = arith.constant 0 : i32
    %c0_i32_1 = arith.constant 0 : i32
    return %c0_i32, %c0_i32_0 : i32, i32
  }
  func.func @transform_4(%arg0: i32) -> (i32, i32) {
    %c0_i32 = arith.constant 0 : i32
    %c0_i32_0 = arith.constant 0 : i32
    return %arg0, %c0_i32 : i32, i32
  }
}

</mosaic_0001>

<bundles_post_ra>
// kernel: tpu_custom_call.1
= control target key start
LH: loop header
LB: loop body
LE: loop exit
PB: predicated region body
PF: predicated region fallthrough
CT: control target
= control target key end

     0   :  { %9 = vsyncpa [#allocation3], 0  ;;  %s506_s0 = inlined_call_operand.hbm [shape: f32[16,768], index: 0, kind: input, shape index: {}]   ;;  %s507_s1 = inlined_call_operand.hbm [shape: f32[8,768], index: 1, kind: input, shape index: {}]   ;;  %s508_s2 = inlined_call_operand.hbm [shape: f32[1,768], index: 2, kind: input, shape index: {}]   ;;  %s509_s3 = inlined_call_operand.hbm [shape: f32[1,768], index: 3, kind: input, shape index: {}]   ;;  %s510_s4 = inlined_call_operand.hbm [shape: f32[16,768], index: 4, kind: output, shape index: {}]  }
   0x1   :  { %10 = vsyncpa [#allocation6], 0 }
   0x2   :  { %11 = vsyncpa [#allocation9], 0 }
   0x3   :  { %12 = vsyncpa [#allocation4], 0  ;;  %s408_s15 = smov [#allocation5]   ;;  %s409_s17 = smov [#allocation2]  }
   0x4   :  { %s31_s16 = sshll.u32 %s408_s15, 4  ;;  %s18_s18 = sshll.u32 %s409_s17, 4  ;;  %s32_s16 = int_to_ptr.vmem [resolvable:$true] %s31_s16  ;;  %s19_s18 = int_to_ptr.vmem [resolvable:$true] %s18_s18 }
   0x5   :  { %s308_s19 = scalar_lea.vmem %s32_s16, 768  ;;  %p313_p1 = scmp.lt.s32.totalorder %s32_s16, %s32_s16 }
   0x6   :  { %p309_p0 = scmp.ne.s32.totalorder %s32_s16, %s308_s19  ;;  %p314_p2 = scmp.lt.s32.totalorder %s308_s19, %s308_s19 }
   0x8   :  { %p315_p3 = por %p314_p2, %p313_p1 }
   0xa   :  { %p316_p4 = pnand %p315_p3, %p309_p0 }
   0xc   :  { %319 = shalt.err (!%p316_p4)
}
   0xd   :  { %34 = dma.hbm_to_vmem [thread:$0]  %s507_s1, 768, %s32_s16, [#allocation6]  }
   0xe   :  { %s328_s22 = scalar_lea.vmem %s19_s18, 1536  ;;  %p333_p6 = scmp.lt.s32.totalorder %s19_s18, %s19_s18 }
   0xf   :  { %p329_p5 = scmp.ne.s32.totalorder %s19_s18, %s328_s22  ;;  %p334_p7 = scmp.lt.s32.totalorder %s328_s22, %s328_s22 }
  0x11   :  { %p335_p8 = por %p334_p7, %p333_p6 }
  0x13   :  { %p336_p9 = pnand %p335_p8, %p329_p5 }
  0x15   :  { %339 = shalt.err (!%p336_p9)
}
  0x16   :  { %s410_s23 = smov 768   ;;  %s411_s24 = smov 48  }
  0x17   :  { %24 = dma.hbm_to_vmem [thread:$0]  %s506_s0, 1536, %s19_s18, [#allocation3], %s410_s23, %s410_s23, %s411_s24  }
  0x18   :  { %s412_s27 = smov [#allocation7]   ;;  %s413_s29 = smov [#allocation8]  }
  0x19   :  { %s41_s28 = sshll.u32 %s412_s27, 4  ;;  %s51_s1 = sshll.u32 %s413_s29, 4  ;;  %s42_s28 = int_to_ptr.vmem [resolvable:$true] %s41_s28  ;;  %s52_s1 = int_to_ptr.vmem [resolvable:$true] %s51_s1 }
  0x1a   :  { %s348_s30 = scalar_lea.vmem %s42_s28, 96  ;;  %p353_p11 = scmp.lt.s32.totalorder %s42_s28, %s42_s28 }
  0x1b   :  { %p349_p10 = scmp.ne.s32.totalorder %s42_s28, %s348_s30  ;;  %p354_p12 = scmp.lt.s32.totalorder %s348_s30, %s348_s30 }
  0x1d   :  { %p355_p13 = por %p354_p12, %p353_p11 }
  0x1f   :  { %p356_p0 = pnand %p355_p13, %p349_p10 }
  0x21   :  { %359 = shalt.err (!%p356_p0)
}
  0x22   :  { %44 = dma.hbm_to_vmem [thread:$0]  %s508_s2, 96, %s42_s28, [#allocation6]  }
  0x23   :  { %s368_s7 = scalar_lea.vmem %s52_s1, 96  ;;  %p373_p2 = scmp.lt.s32.totalorder %s52_s1, %s52_s1 }
  0x24   :  { %p369_p1 = scmp.ne.s32.totalorder %s52_s1, %s368_s7  ;;  %p374_p3 = scmp.lt.s32.totalorder %s368_s7, %s368_s7 }
  0x26   :  { %p375_p4 = por %p374_p3, %p373_p2 }
  0x28   :  { %p376_p5 = pnand %p375_p4, %p369_p1 }
  0x2a   :  { %379 = shalt.err (!%p376_p5)
}
  0x2b   :  { %54 = dma.hbm_to_vmem [thread:$0]  %s509_s3, 96, %s52_s1, [#allocation9]  }
  0x2c   :  { %400 = dma.done.wait [#allocation3], 1536  }
  0x2d   :  { %401 = vsyncadd [#allocation3], 4294965760 }
  0x2e   :  { %402 = dma.done.wait [#allocation6], 864  }
  0x2f   :  { %403 = vsyncadd [#allocation6], 4294966432 }
  0x30   :  { %404 = dma.done.wait [#allocation9], 96  }
  0x31   :  { %405 = vsyncadd [#allocation9], 4294967200  ;;  %v67_v0 = vld [vmem:[#allocation5] sm:$0xff]  ;;  %v68_v1 = vld [vmem:[#allocation5 + $0x8] sm:$0xff]  ;;  %s414_s2 = smov [#allocation10]  }
  0x32   :  { %v69_v2 = vld [vmem:[#allocation5 + $0x10] sm:$0xff]  ;;  %v70_v3 = vld [vmem:[#allocation5 + $0x18] sm:$0xff]  ;;  %v73_v4 = vld [vmem:[#allocation2] sm:$0xff]  ;;  %s275_s3 = sshll.u32 %s414_s2, 4  ;;  %s276_s3 = int_to_ptr.vmem [resolvable:$true] %s275_s3 }
  0x33   :  { %v74_v5 = vld [vmem:[#allocation2 + $0x8] sm:$0xff]  ;;  %v75_v6 = vld [vmem:[#allocation2 + $0x10] sm:$0xff]  ;;  %v71_v7 = vld [vmem:[#allocation5 + $0x20] sm:$0xff]  ;;  %v85_v10 = vadd.f32 %v73_v4, %v67_v0  ;;  %s380_s9 = scalar_lea.vmem %s276_s3, 1536  ;;  %p385_p7 = scmp.lt.s32.totalorder %s276_s3, %s276_s3 }
  0x34   :  { %v76_v8 = vld [vmem:[#allocation2 + $0x18] sm:$0xff]  ;;  %v77_v9 = vld [vmem:[#allocation2 + $0x20] sm:$0xff]  ;;  %v86_v11 = vadd.f32 %v74_v5, %v68_v1  ;;  %v87_v12 = vadd.f32 %v75_v6, %v69_v2  ;;  %v79_v14 = vld [vmem:[#allocation2 + $0x30] sm:$0xff]  ;;  %p381_p6 = scmp.ne.s32.totalorder %s276_s3, %s380_s9  ;;  %p386_p8 = scmp.lt.s32.totalorder %s380_s9, %s380_s9 }
  0x35   :  { %v88_v13 = vadd.f32 %v76_v8, %v70_v3  ;;  %v80_v15 = vld [vmem:[#allocation2 + $0x38] sm:$0xff]  ;;  %v81_v16 = vld [vmem:[#allocation2 + $0x40] sm:$0xff]  ;;  %v82_v18 = vld [vmem:[#allocation2 + $0x48] sm:$0xff]  ;;  %v91_v19 = vadd.f32 %v79_v14, %v67_v0  ;;  %v89_v25 = vadd.f32 %v77_v9, %v71_v7 }
  0x36   :  { %v99_v17 = vadd.f32 %v86_v11, %v85_v10  ;;  %v92_v20 = vadd.f32 %v80_v15, %v68_v1  ;;  %v93_v21 = vadd.f32 %v81_v16, %v69_v2  ;;  %v72_v22 = vld [vmem:[#allocation5 + $0x28] sm:$0xff]  ;;  %v83_v24 = vld [vmem:[#allocation2 + $0x50] sm:$0xff]  ;;  %v94_v27 = vadd.f32 %v82_v18, %v70_v3  ;;  %v84_v29 = vld [vmem:[#allocation2 + $0x58] sm:$0xff]  ;;  %p387_p9 = por %p386_p8, %p385_p7 }
  0x37   :  { %v78_v23 = vld [vmem:[#allocation2 + $0x28] sm:$0xff]  ;;  %v95_v32 = vadd.f32 %v83_v24, %v71_v7  ;;  %v96_v35 = vadd.f32 %v84_v29, %v72_v22  ;;  %v98_v29 = vld [vmem:[#allocation8] sm:$0x3f] }
  0x38   :  { %v100_v26 = vadd.f32 %v99_v17, %v87_v12  ;;  %v106_v28 = vadd.f32 %v92_v20, %v91_v19  ;;  %v90_v30 = vadd.f32 %v78_v23, %v72_v22  ;;  %p388_p10 = pnand %p387_p9, %p381_p6 }
  0x3a   :  { %v101_v31 = vadd.f32 %v100_v26, %v88_v13  ;;  %v107_v33 = vadd.f32 %v106_v28, %v93_v21  ;;  %v97_v26 = vld [vmem:[#allocation7] sm:$0x3f] }
  0x3c   :  { %v102_v34 = vadd.f32 %v101_v31, %v89_v25  ;;  %v108_v36 = vadd.f32 %v107_v33, %v94_v27 }
  0x3e   :  { %v103_v37 = vadd.f32 %v102_v34, %v90_v30  ;;  %v109_v38 = vadd.f32 %v108_v36, %v95_v32 }
  0x40   :  { %104 = vadd.xlane.f32.xlu0 %v103_v37  ;;  %v110_v39 = vadd.f32 %v109_v38, %v96_v35 }
  0x44   :  { %111 = vadd.xlane.f32.xlu0 %v110_v39 }
  0xc9   :  { %v105_v40 = vpop.xlane.xlu0 %104 }
  0xca   :  { %v114_v41 = vmul.f32 0.0013020834, %v105_v40 }
  0xcc   :  { %v455_v42 = vsub.f32 %v85_v10, %v114_v41  ;;  %v457_v43 = vsub.f32 %v86_v11, %v114_v41  ;;  %v459_v44 = vsub.f32 %v87_v12, %v114_v41  ;;  %v461_v46 = vsub.f32 %v88_v13, %v114_v41 }
  0xcd   :  { %v112_v45 = vpop.xlane.xlu0 %111  ;;  %v120_v50 = vsub.f32 %v89_v25, %v114_v41  ;;  %v121_v56 = vsub.f32 %v90_v30, %v114_v41 }
  0xce   :  { %v115_v47 = vmul.f32 0.0013020834, %v112_v45  ;;  %v128_v48 = vmul.f32 %v455_v42, %v455_v42  ;;  %v129_v49 = vmul.f32 %v457_v43, %v457_v43  ;;  %v130_v51 = vmul.f32 %v459_v44, %v459_v44 }
  0xcf   :  { %v131_v57 = vmul.f32 %v461_v46, %v461_v46  ;;  %v132_v62 = vmul.f32 %v120_v50, %v120_v50  ;;  %v133_v3 = vmul.f32 %v121_v56, %v121_v56 }
  0xd0   :  { %v140_v52 = vadd.f32 %v129_v49, %v128_v48  ;;  %v469_v53 = vsub.f32 %v91_v19, %v115_v47  ;;  %v471_v54 = vsub.f32 %v92_v20, %v115_v47  ;;  %v473_v55 = vsub.f32 %v93_v21, %v115_v47 }
  0xd1   :  { %v477_v59 = vsub.f32 %v94_v27, %v115_v47  ;;  %v483_v0 = vsub.f32 %v95_v32, %v115_v47  ;;  %v127_v5 = vsub.f32 %v96_v35, %v115_v47  ;;  %v173_v19 = vlaneseq }
  0xd2   :  { %v141_v58 = vadd.f32 %v140_v52, %v130_v51  ;;  %v134_v60 = vmul.f32 %v469_v53, %v469_v53  ;;  %v135_v61 = vmul.f32 %v471_v54, %v471_v54  ;;  %v136_v1 = vmul.f32 %v473_v55, %v473_v55 }
  0xd3   :  { %v137_v6 = vmul.f32 %v477_v59, %v477_v59  ;;  %v138_v9 = vmul.f32 %v483_v0, %v483_v0  ;;  %v139_v11 = vmul.f32 %v127_v5, %v127_v5  ;;  %v174_v21 = vshrl.u32 %v173_v19, 7 }
  0xd4   :  { %v142_v63 = vadd.f32 %v141_v58, %v131_v57  ;;  %v147_v2 = vadd.f32 %v135_v61, %v134_v60 }
  0xd5   :  { %v175_v22 = vsub.s32 0, %v174_v21  ;;  %v179_v23 = vsub.s32 1, %v174_v21  ;;  %v183_v24 = vsub.s32 2, %v174_v21  ;;  %v187_v25 = vsub.s32 3, %v174_v21 }
  0xd6   :  { %v143_v4 = vadd.f32 %v142_v63, %v132_v62  ;;  %v148_v7 = vadd.f32 %v147_v2, %v136_v1  ;;  %v191_v27 = vsub.s32 4, %v174_v21  ;;  %v195_v28 = vsub.s32 5, %v174_v21 }
  0xd7   :  { %v176_v30 = vrot.slane %v97_v26, %v175_v22  ;;  %v180_v31 = vrot.slane %v97_v26, %v179_v23  ;;  %v184_v32 = vrot.slane %v97_v26, %v183_v24  ;;  %v188_v33 = vrot.slane %v97_v26, %v187_v25 }
  0xd8   :  { %v144_v8 = vadd.f32 %v143_v4, %v133_v3  ;;  %v149_v10 = vadd.f32 %v148_v7, %v137_v6  ;;  %v192_v35 = vrot.slane %v97_v26, %v191_v27  ;;  %v196_v36 = vrot.slane %v97_v26, %v195_v28 }
  0xd9   :  { %v219_v37 = vrot.slane %v98_v29, %v175_v22  ;;  %v223_v38 = vrot.slane %v98_v29, %v179_v23  ;;  %v227_v49 = vrot.slane %v98_v29, %v183_v24  ;;  %v231_v51 = vrot.slane %v98_v29, %v187_v25 }
  0xda   :  { %145 = vadd.xlane.f32.xlu1 %v144_v8  ;;  %v150_v12 = vadd.f32 %v149_v10, %v138_v9  ;;  %v235_v58 = vrot.slane %v98_v29, %v191_v27  ;;  %v239_v60 = vrot.slane %v98_v29, %v195_v28 }
  0xdc   :  { %v151_v13 = vadd.f32 %v150_v12, %v139_v11 }
  0xde   :  { %152 = vadd.xlane.f32.xlu1 %v151_v13 }
 0x163   :  { %v146_v14 = vpop.xlane.xlu1 %145 }
 0x164   :  { %v154_v15 = vmul.f32 0.0013020834, %v146_v14 }
 0x166   :  { %v156_v16 = vadd.f32 1e-12, %v154_v15 }
 0x167   :  { %v153_v17 = vpop.xlane.xlu1 %152 }
 0x168   :  { %296 = vrsqrt.f32 %v156_v16  ;;  %v155_v18 = vmul.f32 0.0013020834, %v153_v17 }
 0x16a   :  { %v157_v20 = vadd.f32 1e-12, %v155_v18 }
 0x16c   :  { %298 = vrsqrt.f32 %v157_v20 }
 0x175   :  { %v297_v34 = vpop.eup %296 }
 0x176   :  { %v160_v39 = vmul.f32 %v297_v34, %v455_v42  ;;  %v161_v40 = vmul.f32 %v297_v34, %v457_v43  ;;  %v162_v41 = vmul.f32 %v297_v34, %v459_v44  ;;  %v163_v45 = vmul.f32 %v297_v34, %v461_v46 }
 0x177   :  { %v164_v47 = vmul.f32 %v297_v34, %v120_v50  ;;  %v165_v48 = vmul.f32 %v297_v34, %v121_v56 }
 0x178   :  { %v203_v52 = vmul.f32 %v176_v30, %v160_v39  ;;  %v204_v57 = vmul.f32 %v180_v31, %v161_v40  ;;  %v205_v62 = vmul.f32 %v184_v32, %v162_v41  ;;  %v206_v63 = vmul.f32 %v188_v33, %v163_v45 }
 0x179   :  { %v299_v61 = vpop.eup %298  ;;  %v207_v1 = vmul.f32 %v192_v35, %v164_v47  ;;  %v208_v2 = vmul.f32 %v196_v36, %v165_v48 }
 0x17a   :  { %v166_v42 = vmul.f32 %v299_v61, %v469_v53  ;;  %v167_v43 = vmul.f32 %v299_v61, %v471_v54  ;;  %v168_v44 = vmul.f32 %v299_v61, %v473_v55  ;;  %v169_v46 = vmul.f32 %v299_v61, %v477_v59 }
 0x17b   :  { %v170_v50 = vmul.f32 %v299_v61, %v483_v0  ;;  %v171_v56 = vmul.f32 %v299_v61, %v127_v5  ;;  %v246_v3 = vadd.f32 %v219_v37, %v203_v52  ;;  %v247_v4 = vadd.f32 %v223_v38, %v204_v57 }
 0x17c   :  { %v209_v6 = vmul.f32 %v176_v30, %v166_v42  ;;  %v210_v7 = vmul.f32 %v180_v31, %v167_v43  ;;  %v211_v8 = vmul.f32 %v184_v32, %v168_v44  ;;  %v212_v9 = vmul.f32 %v188_v33, %v169_v46 }
 0x17d   :  { %v213_v10 = vmul.f32 %v192_v35, %v170_v50  ;;  %v214_v11 = vmul.f32 %v196_v36, %v171_v56  ;;  %v248_v53 = vadd.f32 %v227_v49, %v205_v62  ;;  %v249_v12 = vadd.f32 %v231_v51, %v206_v63  ;;  %258 = vst [vmem:[#allocation10] sm:$0xff] %v246_v3 }
 0x17e   :  { %259 = vst [vmem:[#allocation10 + $0x8] sm:$0xff] %v247_v4  ;;  %v250_v54 = vadd.f32 %v235_v58, %v207_v1  ;;  %v251_v55 = vadd.f32 %v239_v60, %v208_v2  ;;  %v252_v59 = vadd.f32 %v219_v37, %v209_v6  ;;  %v253_v13 = vadd.f32 %v223_v38, %v210_v7 }
 0x17f   :  { %v254_v0 = vadd.f32 %v227_v49, %v211_v8  ;;  %v255_v5 = vadd.f32 %v231_v51, %v212_v9  ;;  %v256_v14 = vadd.f32 %v235_v58, %v213_v10  ;;  %v257_v15 = vadd.f32 %v239_v60, %v214_v11  ;;  %260 = vst [vmem:[#allocation10 + $0x10] sm:$0xff] %v248_v53 }
 0x180   :  { %261 = vst [vmem:[#allocation10 + $0x18] sm:$0xff] %v249_v12  ;;  %262 = vst [vmem:[#allocation10 + $0x20] sm:$0xff] %v250_v54 }
 0x181   :  { %263 = vst [vmem:[#allocation10 + $0x28] sm:$0xff] %v251_v55  ;;  %264 = vst [vmem:[#allocation10 + $0x30] sm:$0xff] %v252_v59 }
 0x182   :  { %265 = vst [vmem:[#allocation10 + $0x38] sm:$0xff] %v253_v13  ;;  %266 = vst [vmem:[#allocation10 + $0x40] sm:$0xff] %v254_v0 }
 0x183   :  { %267 = vst [vmem:[#allocation10 + $0x48] sm:$0xff] %v255_v5  ;;  %268 = vst [vmem:[#allocation10 + $0x50] sm:$0xff] %v256_v14 }
 0x184   :  { %269 = vst [vmem:[#allocation10 + $0x58] sm:$0xff] %v257_v15 }
 0x185   :  { %391 = shalt.err (!%p388_p10)
}
 0x186   :  { %281 = dma.vmem_to_hbm [thread:$0]  %s276_s3, 1536, %s510_s4, [#allocation4], %s410_s23, %s410_s23, %s411_s24  }
 0x187   :  { %406 = dma.done.wait [#allocation4], 1536  }
 0x188   :  { %407 = vsyncadd [#allocation4], 4294965760 }
 0x189   :  { %285 = vsyncpa [#allocation3], 1 }
 0x18a   :  { %286 = vsyncpa [#allocation6], 1 }
 0x18b   :  { %287 = vsyncpa [#allocation9], 1 }
 0x18c   :  { %288 = vsyncpa [#allocation4], 1 }

</bundles_post_ra>
